<compile_context>
chip_gen: v5e
topology: v5e:2x2
jax: 0.10.0
libtpu: 0.0.40
codegen_flags: <defaults>
</compile_context>

<pallas_src>
import functools

import jax
import jax.numpy as jnp
from jax import lax
from jax.experimental import pallas as pl
from jax.experimental.pallas import tpu as pltpu


def temporal_block_kernel(x_ref, w1_ref, w2_ref, o_ref,
                          *, L, K, dilation, pad, tile_n, c_out):
    # x_ref: (tile_n, C_in, L + pad)  -- left-padded time strips, channels on sublanes,
    #                                    time on lanes.
    # w1_ref: (2*C_out, (K+1)*C_in + 1) -- [conv1*BN1 | 0 | shift1] over [0 | wd | bd]
    # w2_ref: (C_out, K*C_out + 1)      -- [conv2*BN2 | shift2]
    # o_ref: (tile_n, C_out, L)
    cdt = x_ref.dtype
    x = x_ref[...]                                   # (tile_n, C_in, L+pad)
    lanes = tile_n * L
    ones = jnp.ones((1, lanes), cdt)

    # ---- layer 1 + residual: single im2col matmul ----
    def slab(start):
        # same time window from every batch strip, laid side by side on lanes
        return jnp.concatenate([x[n, :, start:start + L] for n in range(tile_n)], axis=-1)

    x1 = jnp.concatenate([slab(k * dilation) for k in range(K)]   # K shifted C_in blocks
                         + [slab(pad), ones], axis=0)             # residual block + ones row
    m1 = jnp.dot(w1_ref[...], x1, preferred_element_type=jnp.float32)  # (2*C_out, lanes)
    h1 = jnp.maximum(m1[:c_out], 0.0)    # conv1 -> BN1 -> chomp (folded) -> ReLU
    res = m1[c_out:]                     # 1x1 downsample + bias

    # ---- layer 2: im2col of h1 built in vregs (per-batch left zero pad) ----
    h1c = h1.astype(cdt)

    def shifted(v, shift):
        # per-batch-segment right shift by `shift` lanes with zero fill (causal pad)
        if shift == 0:
            return v
        z = jnp.zeros((v.shape[0], shift), v.dtype)
        segs = []
        for n in range(tile_n):
            segs.append(z)
            segs.append(v[:, n * L:(n + 1) * L - shift])
        return jnp.concatenate(segs, axis=-1)

    x2 = jnp.concatenate([shifted(h1c, pad - k * dilation) for k in range(K)] + [ones],
                         axis=0)                                   # (K*C_out+1, lanes)
    h2 = jnp.maximum(jnp.dot(w2_ref[...], x2, preferred_element_type=jnp.float32), 0.0)

    y = jnp.maximum(h2 + res, 0.0)                                 # (C_out, lanes), f32

    for n in range(tile_n):            # lane-dense (C_out, L) stores, starts multiple of L
        o_ref[n] = y[:, n * L:(n + 1) * L].astype(o_ref.dtype)


def temporal_block(x, params, *, kernel_size, dilation, padding,
                   tile_n=None, compute_dtype=jnp.float32):
    """x: (N, C_in, L) float32, PyTorch NCL layout. Returns (N, C_out, L) float32.

    compute_dtype=jnp.bfloat16 is a valid option for v6e/v7x MXU inputs (epilogue stays f32).
    """
    N, C_in, L = x.shape
    C_out = params["w1"].shape[0]
    K, pad, d = kernel_size, padding, dilation
    eps = 1e-5

    # correctness guard: the chomp-folded construction needs standard causal TCN padding
    assert pad >= (K - 1) * d, "padding must be >= (kernel_size-1)*dilation"

    if tile_n is None:
        # >= 2 grid blocks whenever N >= 2 so v7x's two TensorCores both get work
        tile_n = max(1, N // 2) if N % 2 == 0 else 1
    assert N % tile_n == 0, "batch must divide evenly into batch tiles"
    Lp = L + pad                      # left-pad only; trailing pad frames are never read

    # ---- fold BN (eval mode) + conv biases into the weights (one-time O(C) work) ----
    s1 = params["bn1_gamma"] / jnp.sqrt(params["bn1_var"] + eps)
    t1 = params["bn1_beta"] - params["bn1_mean"] * s1
    s2 = params["bn2_gamma"] / jnp.sqrt(params["bn2_var"] + eps)
    t2 = params["bn2_beta"] - params["bn2_mean"] * s2
    shift1 = params["b1"] * s1 + t1                   # (C_out,)
    shift2 = params["b2"] * s2 + t2                   # (C_out,)

    w1s = params["w1"] * s1[:, None, None]            # (C_out, C_in, K)
    w2s = params["w2"] * s2[:, None, None]            # (C_out, C_out, K)
    wd = params["wd"][:, :, 0]                        # (C_out, C_in)
    bd = params["bd"]                                 # (C_out,)

    z = lambda *s: jnp.zeros(s, jnp.float32)
    # combined layer-1 weights: conv1 rows on top, residual rows below;
    # im2col columns = [K shifted C_in blocks | residual C_in block | ones]
    top = jnp.concatenate([w1s.transpose(0, 2, 1).reshape(C_out, K * C_in),
                           z(C_out, C_in), shift1[:, None]], axis=1)
    bot = jnp.concatenate([z(C_out, K * C_in), wd, bd[:, None]], axis=1)
    w1c = jnp.concatenate([top, bot], axis=0)                          # (2*C_out, (K+1)*C_in+1)
    w2c = jnp.concatenate([w2s.transpose(0, 2, 1).reshape(C_out, K * C_out),
                           shift2[:, None]], axis=1)                   # (C_out, K*C_out+1)

    # NCL layout kept (no transposes); left-pad the time axis only
    x_pad = jnp.pad(x.astype(compute_dtype), ((0, 0), (0, 0), (pad, 0)))
    w1c = w1c.astype(compute_dtype)
    w2c = w2c.astype(compute_dtype)

    kernel = functools.partial(temporal_block_kernel, L=L, K=K, dilation=d,
                               pad=pad, tile_n=tile_n, c_out=C_out)

    out = pl.pallas_call(
        kernel,
        out_shape=jax.ShapeDtypeStruct((N, C_out, L), jnp.float32),
        grid_spec=pltpu.PrefetchScalarGridSpec(
            num_scalar_prefetch=0,
            grid=(N // tile_n,),
            in_specs=[
                pl.BlockSpec((tile_n, C_in, Lp), lambda b: (b, 0, 0)),            # x
                pl.BlockSpec((2 * C_out, (K + 1) * C_in + 1), lambda b: (0, 0)),  # w1c
                pl.BlockSpec((C_out, K * C_out + 1), lambda b: (0, 0)),           # w2c
            ],
            out_specs=pl.BlockSpec((tile_n, C_out, L), lambda b: (b, 0, 0)),
        ),
        compiler_params=pltpu.CompilerParams(
            dimension_semantics=("parallel",),
            # TODO(synk): re-derive tile_n/L tiling and this limit for v7x (64 MiB VMEM)
            # at production shapes; trivially fits at these sizes.
            vmem_limit_bytes=32 * 1024 * 1024,
        ),
    )(x_pad, w1c, w2c)

    return out                                   # already (N, C_out, L)


def ref_forward(x, params, *, kernel_size, dilation, padding):
    """Pure-JAX reference matching the PyTorch eval-mode forward."""
    eps = 1e-5

    def conv1d(y, w, b, pad, dil):
        o = lax.conv_general_dilated(y, w, window_strides=(1,), padding=[(pad, pad)],
                                     rhs_dilation=(dil,),
                                     dimension_numbers=("NCH", "OIH", "NCH"))
        return o + b[None, :, None]

    def bn(y, g, bt, m, v):
        return (y - m[None, :, None]) / jnp.sqrt(v[None, :, None] + eps) \
            * g[None, :, None] + bt[None, :, None]

    def chomp(y):
        return y[:, :, :-padding] if padding > 0 else y

    h = conv1d(x, params["w1"], params["b1"], padding, dilation)
    h = bn(h, params["bn1_gamma"], params["bn1_beta"], params["bn1_mean"], params["bn1_var"])
    h = jax.nn.relu(chomp(h))
    h = conv1d(h, params["w2"], params["b2"], padding, dilation)
    h = bn(h, params["bn2_gamma"], params["bn2_beta"], params["bn2_mean"], params["bn2_var"])
    h = jax.nn.relu(chomp(h))
    res = conv1d(x, params["wd"], params["bd"], 0, 1)
    return jax.nn.relu(h + res)


if __name__ == "__main__":
    # module config: TemporalBlock(num_inputs=4, num_outputs=8, kernel_size=3,
    #                              stride=1, padding=2, dilation=1)
    C_in, C_out, K, dilation = 4, 8, 3, 1
    padding = (K - 1) * dilation  # = 2 (standard causal-TCN padding)
    N, L = 4, 128                 # L multiple of 128 -> lane-dense output stores

    key = jax.random.PRNGKey(0)
    ks = jax.random.split(key, 13)
    params = {
        "w1": 0.2 * jax.random.normal(ks[0], (C_out, C_in, K), jnp.float32),
        "b1": 0.1 * jax.random.normal(ks[1], (C_out,), jnp.float32),
        "w2": 0.2 * jax.random.normal(ks[2], (C_out, C_out, K), jnp.float32),
        "b2": 0.1 * jax.random.normal(ks[3], (C_out,), jnp.float32),
        "wd": 0.2 * jax.random.normal(ks[4], (C_out, C_in, 1), jnp.float32),
        "bd": 0.1 * jax.random.normal(ks[5], (C_out,), jnp.float32),
        "bn1_gamma": 1.0 + 0.1 * jax.random.normal(ks[6], (C_out,), jnp.float32),
        "bn1_beta": 0.1 * jax.random.normal(ks[7], (C_out,), jnp.float32),
        "bn1_mean": 0.1 * jax.random.normal(ks[8], (C_out,), jnp.float32),
        "bn1_var": 0.5 + jax.random.uniform(ks[9], (C_out,), jnp.float32),
        "bn2_gamma": 1.0 + 0.1 * jax.random.normal(ks[10], (C_out,), jnp.float32),
        "bn2_beta": 0.1 * jax.random.normal(ks[11], (C_out,), jnp.float32),
        "bn2_mean": jnp.zeros((C_out,), jnp.float32),
        "bn2_var": jnp.ones((C_out,), jnp.float32),
    }

    x = jax.random.normal(ks[12], (N, C_in, L), jnp.float32)

    out = temporal_block(x, params, kernel_size=K, dilation=dilation, padding=padding)
    out = jax.block_until_ready(out)

    ref = ref_forward(x, params, kernel_size=K, dilation=dilation, padding=padding)
    assert out.shape == (N, C_out, L), out.shape
    err = float(jnp.abs(out - ref).max())
    assert jnp.allclose(out, ref, rtol=2e-4, atol=2e-4), err

    print("KERNEL_OK")
</pallas_src>

<mosaic_0001>
module attributes {stable_mosaic.version = 11 : i64} {
  func.func @temporal_block_kernel(%arg0: i32, %arg1: memref<2x4x130xf32, #tpu.memory_space<vmem>>, %arg2: memref<16x17xf32, #tpu.memory_space<vmem>>, %arg3: memref<8x25xf32, #tpu.memory_space<vmem>>, %arg4: memref<2x8x128xf32, #tpu.memory_space<vmem>>) attributes {dimension_semantics = [#tpu.dimension_semantics<parallel>], iteration_bounds = array<i64: 2>, scalar_prefetch = 0 : i64, scratch_operands = 0 : i64, tpu.core_type = #tpu.core_type<tc>, window_params = [{transform_indices = @transform_0, window_bounds = array<i64: 2, 4, 130>}, {pipeline_mode = #tpu.pipeline_mode<synchronous>, transform_indices = @transform_1, window_bounds = array<i64: 16, 17>}, {pipeline_mode = #tpu.pipeline_mode<synchronous>, transform_indices = @transform_2, window_bounds = array<i64: 8, 25>}, {transform_indices = @transform_3, window_bounds = array<i64: 2, 8, 128>}]} {
    %c0 = arith.constant 0 : index
    %c0_0 = arith.constant 0 : index
    %c0_1 = arith.constant 0 : index
    %0 = vector.load %arg1[%c0, %c0_0, %c0_1] : memref<2x4x130xf32, #tpu.memory_space<vmem>>, vector<2x4x130xf32>
    %cst = arith.constant 1.000000e+00 : f32
    %1 = vector.broadcast %cst : f32 to vector<1x256xf32>
    %2 = vector.extract_strided_slice %0 {offsets = [0, 0, 0], sizes = [1, 4, 128], strides = [1, 1, 1]} : vector<2x4x130xf32> to vector<1x4x128xf32>
    %3 = vector.shape_cast %2 : vector<1x4x128xf32> to vector<4x128xf32>
    %4 = vector.extract_strided_slice %0 {offsets = [1, 0, 0], sizes = [1, 4, 128], strides = [1, 1, 1]} : vector<2x4x130xf32> to vector<1x4x128xf32>
    %5 = vector.shape_cast %4 : vector<1x4x128xf32> to vector<4x128xf32>
    %6 = tpu.concatenate %3, %5 in 1 : vector<4x128xf32>, vector<4x128xf32> -> vector<4x256xf32>
    %7 = vector.extract_strided_slice %0 {offsets = [0, 0, 1], sizes = [1, 4, 128], strides = [1, 1, 1]} : vector<2x4x130xf32> to vector<1x4x128xf32>
    %8 = vector.shape_cast %7 : vector<1x4x128xf32> to vector<4x128xf32>
    %9 = vector.extract_strided_slice %0 {offsets = [1, 0, 1], sizes = [1, 4, 128], strides = [1, 1, 1]} : vector<2x4x130xf32> to vector<1x4x128xf32>
    %10 = vector.shape_cast %9 : vector<1x4x128xf32> to vector<4x128xf32>
    %11 = tpu.concatenate %8, %10 in 1 : vector<4x128xf32>, vector<4x128xf32> -> vector<4x256xf32>
    %12 = vector.extract_strided_slice %0 {offsets = [0, 0, 2], sizes = [1, 4, 128], strides = [1, 1, 1]} : vector<2x4x130xf32> to vector<1x4x128xf32>
    %13 = vector.shape_cast %12 : vector<1x4x128xf32> to vector<4x128xf32>
    %14 = vector.extract_strided_slice %0 {offsets = [1, 0, 2], sizes = [1, 4, 128], strides = [1, 1, 1]} : vector<2x4x130xf32> to vector<1x4x128xf32>
    %15 = vector.shape_cast %14 : vector<1x4x128xf32> to vector<4x128xf32>
    %16 = tpu.concatenate %13, %15 in 1 : vector<4x128xf32>, vector<4x128xf32> -> vector<4x256xf32>
    %17 = vector.extract_strided_slice %0 {offsets = [0, 0, 2], sizes = [1, 4, 128], strides = [1, 1, 1]} : vector<2x4x130xf32> to vector<1x4x128xf32>
    %18 = vector.shape_cast %17 : vector<1x4x128xf32> to vector<4x128xf32>
    %19 = vector.extract_strided_slice %0 {offsets = [1, 0, 2], sizes = [1, 4, 128], strides = [1, 1, 1]} : vector<2x4x130xf32> to vector<1x4x128xf32>
    %20 = vector.shape_cast %19 : vector<1x4x128xf32> to vector<4x128xf32>
    %21 = tpu.concatenate %18, %20 in 1 : vector<4x128xf32>, vector<4x128xf32> -> vector<4x256xf32>
    %22 = tpu.concatenate %6, %11, %16, %21, %1 in 0 : vector<4x256xf32>, vector<4x256xf32>, vector<4x256xf32>, vector<4x256xf32>, vector<1x256xf32> -> vector<17x256xf32>
    %c0_2 = arith.constant 0 : index
    %c0_3 = arith.constant 0 : index
    %23 = vector.load %arg2[%c0_2, %c0_3] : memref<16x17xf32, #tpu.memory_space<vmem>>, vector<16x17xf32>
    %cst_4 = arith.constant dense<0.000000e+00> : vector<16x256xf32>
    %24 = tpu.matmul %23, %22, %cst_4 {dimension_numbers = #tpu.dot_dimension_numbers<[1], [0], [0], [1], [0, 0, 1, 1], [], []>} : vector<16x17xf32>, vector<17x256xf32>, vector<16x256xf32> -> vector<16x256xf32>
    %25 = vector.extract_strided_slice %24 {offsets = [0, 0], sizes = [8, 256], strides = [1, 1]} : vector<16x256xf32> to vector<8x256xf32>
    %cst_5 = arith.constant 0.000000e+00 : f32
    %26 = vector.broadcast %cst_5 : f32 to vector<8x256xf32>
    %27 = arith.maximumf %25, %26 : vector<8x256xf32>
    %28 = vector.extract_strided_slice %24 {offsets = [8, 0], sizes = [8, 256], strides = [1, 1]} : vector<16x256xf32> to vector<8x256xf32>
    %cst_6 = arith.constant 0.000000e+00 : f32
    %29 = vector.broadcast %cst_6 : f32 to vector<8x2xf32>
    %30 = vector.extract_strided_slice %27 {offsets = [0, 0], sizes = [8, 126], strides = [1, 1]} : vector<8x256xf32> to vector<8x126xf32>
    %31 = vector.extract_strided_slice %27 {offsets = [0, 128], sizes = [8, 126], strides = [1, 1]} : vector<8x256xf32> to vector<8x126xf32>
    %32 = tpu.concatenate %29, %30, %29, %31 in 1 : vector<8x2xf32>, vector<8x126xf32>, vector<8x2xf32>, vector<8x126xf32> -> vector<8x256xf32>
    %cst_7 = arith.constant 0.000000e+00 : f32
    %33 = vector.broadcast %cst_7 : f32 to vector<8x1xf32>
    %34 = vector.extract_strided_slice %27 {offsets = [0, 0], sizes = [8, 127], strides = [1, 1]} : vector<8x256xf32> to vector<8x127xf32>
    %35 = vector.extract_strided_slice %27 {offsets = [0, 128], sizes = [8, 127], strides = [1, 1]} : vector<8x256xf32> to vector<8x127xf32>
    %36 = tpu.concatenate %33, %34, %33, %35 in 1 : vector<8x1xf32>, vector<8x127xf32>, vector<8x1xf32>, vector<8x127xf32> -> vector<8x256xf32>
    %37 = tpu.concatenate %32, %36, %27, %1 in 0 : vector<8x256xf32>, vector<8x256xf32>, vector<8x256xf32>, vector<1x256xf32> -> vector<25x256xf32>
    %c0_8 = arith.constant 0 : index
    %c0_9 = arith.constant 0 : index
    %38 = vector.load %arg3[%c0_8, %c0_9] : memref<8x25xf32, #tpu.memory_space<vmem>>, vector<8x25xf32>
    %cst_10 = arith.constant dense<0.000000e+00> : vector<8x256xf32>
    %39 = tpu.matmul %38, %37, %cst_10 {dimension_numbers = #tpu.dot_dimension_numbers<[1], [0], [0], [1], [0, 0, 1, 1], [], []>} : vector<8x25xf32>, vector<25x256xf32>, vector<8x256xf32> -> vector<8x256xf32>
    %cst_11 = arith.constant 0.000000e+00 : f32
    %40 = vector.broadcast %cst_11 : f32 to vector<8x256xf32>
    %41 = arith.maximumf %39, %40 : vector<8x256xf32>
    %42 = arith.addf %41, %28 : vector<8x256xf32>
    %cst_12 = arith.constant 0.000000e+00 : f32
    %43 = vector.broadcast %cst_12 : f32 to vector<8x256xf32>
    %44 = arith.maximumf %42, %43 : vector<8x256xf32>
    %45 = vector.extract_strided_slice %44 {offsets = [0, 0], sizes = [8, 128], strides = [1, 1]} : vector<8x256xf32> to vector<8x128xf32>
    %c0_13 = arith.constant 0 : index
    %c0_14 = arith.constant 0 : index
    %c0_15 = arith.constant 0 : index
    %46 = vector.load %arg4[%c0_13, %c0_14, %c0_15] : memref<2x8x128xf32, #tpu.memory_space<vmem>>, vector<1x8x128xf32>
    %47 = vector.shape_cast %46 : vector<1x8x128xf32> to vector<8x128xf32>
    %48 = vector.shape_cast %45 : vector<8x128xf32> to vector<1x8x128xf32>
    tpu.vector_store %arg4[%c0_13, %c0_14, %c0_15], %48 {strides = array<i32>} : memref<2x8x128xf32, #tpu.memory_space<vmem>>, vector<1x8x128xf32>,
    %49 = vector.extract_strided_slice %44 {offsets = [0, 128], sizes = [8, 128], strides = [1, 1]} : vector<8x256xf32> to vector<8x128xf32>
    %c1 = arith.constant 1 : index
    %c0_16 = arith.constant 0 : index
    %c0_17 = arith.constant 0 : index
    %50 = vector.load %arg4[%c1, %c0_16, %c0_17] : memref<2x8x128xf32, #tpu.memory_space<vmem>>, vector<1x8x128xf32>
    %51 = vector.shape_cast %50 : vector<1x8x128xf32> to vector<8x128xf32>
    %52 = vector.shape_cast %49 : vector<8x128xf32> to vector<1x8x128xf32>
    tpu.vector_store %arg4[%c1, %c0_16, %c0_17], %52 {strides = array<i32>} : memref<2x8x128xf32, #tpu.memory_space<vmem>>, vector<1x8x128xf32>,
    return
  }
  func.func @transform_0(%arg0: i32) -> (i32, i32, i32) {
    %c0_i32 = arith.constant 0 : i32
    %c0_i32_0 = arith.constant 0 : i32
    %c0_i32_1 = arith.constant 0 : i32
    return %arg0, %c0_i32, %c0_i32_0 : i32, i32, i32
  }
  func.func @transform_1(%arg0: i32) -> (i32, i32) {
    %c0_i32 = arith.constant 0 : i32
    %c0_i32_0 = arith.constant 0 : i32
    %c0_i32_1 = arith.constant 0 : i32
    return %c0_i32, %c0_i32_0 : i32, i32
  }
  func.func @transform_2(%arg0: i32) -> (i32, i32) {
    %c0_i32 = arith.constant 0 : i32
    %c0_i32_0 = arith.constant 0 : i32
    %c0_i32_1 = arith.constant 0 : i32
    return %c0_i32, %c0_i32_0 : i32, i32
  }
  func.func @transform_3(%arg0: i32) -> (i32, i32, i32) {
    %c0_i32 = arith.constant 0 : i32
    %c0_i32_0 = arith.constant 0 : i32
    %c0_i32_1 = arith.constant 0 : i32
    return %arg0, %c0_i32, %c0_i32_0 : i32, i32, i32
  }
}

</mosaic_0001>

<bundles_post_ra>
// kernel: tpu_custom_call.1
= control target key start
LH: loop header
LB: loop body
LE: loop exit
PB: predicated region body
PF: predicated region fallthrough
CT: control target
= control target key end

     0   :  { %8 = vsyncpa [#allocation3], 0  ;;  %s1014_s0 = inlined_call_operand.hbm [shape: f32[4,4,130], index: 0, kind: input, shape index: {}]   ;;  %s1015_s1 = inlined_call_operand.hbm [shape: f32[16,17], index: 1, kind: input, shape index: {}]   ;;  %s1016_s2 = inlined_call_operand.hbm [shape: f32[8,25], index: 2, kind: input, shape index: {}]   ;;  %s1017_s3 = inlined_call_operand.hbm [shape: f32[4,8,128], index: 3, kind: output, shape index: {}]  }
   0x1   :  { %10 = vsyncpa [#allocation3 + $0x1], 0 }
   0x2   :  { %11 = vsyncpa [#allocation6], 0 }
   0x3   :  { %12 = vsyncpa [#allocation4], 0 }
   0x4   :  { %14 = vsyncpa [#allocation4 + $0x1], 0  ;;  %s851_s12 = smov 0   ;;  %s853_s13 = smov 0  }
   0x5   :  { %s855_s14 = smov 0   ;;  %s857_s15 = smov 0  }
   0x6 LB: > { %s872_s16 = sadd.s32 4294967295, %s818_s15   ;;  %s521_s17 = sadd.s32 4294967294, %s818_s15   ;;  %s818_s15 = sphi %s857_s15, %s1027_s15   ;;  %s814_s14 = sphi %s855_s14, %s1026_s14   ;;  %s810_s13 = sphi %s853_s13, %s1025_s13   ;;  %s806_s12 = sphi %s851_s12, %s1024_s12  }
   0x7   : > { %p40_p0 = scmp.ne.s32.totalorder %s810_s13, %s806_s12  ;;  %p41_p1 = scmp.eq.s32.totalorder %s872_s16, 0 }
   0x8   : > { %p106_p2 = scmp.eq.s32.totalorder %s872_s16, 1  ;;  %p112_p3 = scmp.eq.s32.totalorder %s521_s17, 1 }
   0x9   : > { %p881_p4 = por %p41_p1, %p40_p0  ;;  %p522_p5 = scmp.ge.s32.totalorder %s818_s15, 1 }
   0xa   : > { %p886_p6 = por %p112_p3, %p40_p0  ;;  %p119_p7 = scmp.lt.s32.totalorder %s818_s15, 3 }
   0xb   : > { %s130_s22 = sshll.u32 %s1015_s1, 4  ;;  %s820_s24 = smov [#allocation5]   ;;  %s131_s22 = int_to_ptr.hbm [resolvable:$true] %s130_s22 }
   0xc   : > { %p894_p8 = pnand %p522_p5, %p119_p7  ;;  %s132_s25 = sshll.u32 %s820_s24, 4  ;;  %s133_s25 = int_to_ptr.vmem [resolvable:$true] %s132_s25 }
   0xd   : > { %s145_s28 = sshll.u32 %s1016_s2, 4  ;;  %s821_s29 = smov 128   ;;  %s146_s28 = int_to_ptr.hbm [resolvable:$true] %s145_s28 }
   0xe   : > { %p574_p9 = pneg %p894_p8  ;;  %s822_s30 = smov 8  }
   0xf   : > { %s823_s4 = smov [#allocation7]   ;;  %s910_s6 = sadd.s32 1, %s818_s15  }
  0x10   : > { %p575_p10 = pnand %p574_p9, %p41_p1  ;;  %s147_s5 = sshll.u32 %s823_s4, 4  ;;  %s148_s5 = int_to_ptr.vmem [resolvable:$true] %s147_s5 }
  0x11   : > { %s27_s7 = sadd.s32 1, %s814_s14  ;;  %s24_s8 = ssub.s32 %s818_s15, %s910_s6 }
  0x12   : > { %577 = dma.hbm_to_vmem [thread:$0]  (!%p575_p10), %s131_s22, 256, %s133_s25, [#allocation6], %s821_s29, %s821_s29, %s822_s30  }
  0x13   : > { %580 = dma.hbm_to_vmem [thread:$0]  (!%p575_p10), %s146_s28, 128, %s148_s5, [#allocation6]  }
  0x14   : > { %p34_p12 = scmp.ne.s32.totalorder %s814_s14, %s810_s13  ;;  %p25_p13 = scmp.eq.s32.totalorder %s24_s8, 0 }
  0x15   : > { %p35_p0 = scmp.eq.s32.totalorder %s818_s15, 0  ;;  %p591_p5 = scmp.lt.s32.totalorder %s818_s15, 2 }
  0x16   : > { %p920_p3 = por %p106_p2, %p34_p12  ;;  %s158_s11 = sand.u32 1, %s814_s14  }
  0x17   : > { %s926_s10 = scalar_select %p25_p13, %s814_s14, %s27_s7  }
  0x18   : > { %p36_p7 = por %p35_p0, %p34_p12  ;;  %s526_s17 = sshll.u32 %s158_s11, 4 }
  0x19   : > { %s560_s20 = sshll.u32 %s818_s15, 4  ;;  %s162_s25 = scalar_lea.vmem [#allocation2], %s526_s17 }
  0x1a   : > { %s168_s24 = scalar_lea.hbm %s1014_s0, %s560_s20  ;;  %s171_s26 = sshll.u32 %s162_s25, 4  ;;  %s172_s26 = int_to_ptr.vmem [resolvable:$true] %s171_s26 }
  0x1b   : > { %s169_s27 = sshll.u32 %s168_s24, 4  ;;  %p933_p2 = pnand %p591_p5, %p36_p7  ;;  %s170_s27 = int_to_ptr.hbm [resolvable:$true] %s169_s27 }
  0x1c   : > { %s159_s4 = scalar_lea.sflag [#allocation3], %s158_s11  ;;  %s718_s5 = sshra.s32 %s170_s27, 4  ;;  %s719_s5 = int_to_ptr.hbm [resolvable:$true] %s718_s5 }
  0x1d   : > { %s720_s7 = scalar_lea.hbm %s719_s5, 16  ;;  %p722_p10 = pneg %p933_p2 }
  0x1e   : > { %p721_p9 = scmp.ne.s32.totalorder %s719_s5, %s720_s7  ;;  %s725_s20 = scalar_lea.hbm %s1014_s0, 32 }
  0x1f   : > { %p726_p0 = scmp.lt.s32.totalorder %s719_s5, %s1014_s0  ;;  %p727_p5 = scmp.lt.s32.totalorder %s725_s20, %s720_s7 }
  0x20   : > { %p723_p12 = pnand %p722_p10, %p721_p9 }
  0x21   : > { %p728_p7 = por %p727_p5, %p726_p0 }
  0x22   : > { %p724_p13 = pneg %p723_p12 }
  0x24   : > { %p729_p11 = pnand %p728_p7, %p724_p13 }
  0x26   : > { %732 = shalt.err (!%p729_p11)
}
  0x27   : > { %584 = dma.hbm_to_vmem [thread:$0]  (!%p933_p2), %s170_s27, 256, %s172_s26, %s159_s4, %s821_s29, %s821_s29, %s822_s30  }
  0x28   : > { %183 = sbr.rel (%p894_p8) target bundleno = 593 (0x251), region = 32  ;;  %s953_s11 = sand.u32 (!%p894_p8), 1, %s810_s13  }
  0x29   : > { %s531_s24 = sshll.u32 (!%p894_p8), %s953_s11, 4  ;;  %s186_s25 = scalar_lea.sflag (!%p894_p8), [#allocation3], %s953_s11 }
  0x2a   : > { %s189_s5 = scalar_lea.vmem (!%p894_p8), [#allocation2], %s531_s24 }
  0x2d   : > { %793 = dma.done.wait (%p881_p4), %s186_s25, 256  }
  0x2e   : > { %795 = vsyncadd (%p881_p4), %s186_s25, 4294967040 }
  0x2f   : > { %797 = dma.done.wait (%p41_p1), [#allocation6], 384  }
  0x30   : > { %799 = vsyncadd (%p41_p1), [#allocation6], 4294966912  ;;  %v225_v0 = vld [vmem:[%s189_s5] sm:$0xff]  ;;  %v226_v1 = vld [vmem:[%s189_s5 + $0x8] sm:$0xff]  ;;  %s824_s23 = smov 127   ;;  %s825_s18 = smov 126  }
  0x31   : > { %228 = vst [vmem:[#allocation1] ss:$2 sm:$0xff] %v225_v0  ;;  %vm287_vm0 = vcmask 1040384   ;;  %v826_v14 = vmov 1.0   ;;  %vm235_vm1 = vcmask 1039360   ;;  %vm253_vm2 = vcmask 1031168  }
  0x32   : > { %535 = vmatpush.msk.msra.mxu0 %vm287_vm0, %v826_v14  ;;  %538 = vmatpush.msk.msra.mxu1 %vm287_vm0, %v826_v14  ;;  %vm273_vm3 = vcmask 1043456   ;;  %v278_v30 = vld [vmem:[#allocation5] sm:$0xff]  ;;  %vm280_vm4 = vcmask 138240   ;;  %s827_s29 = smov 1   ;;  %s828_s30 = smov 2   ;;  %vm356_vm5 = vcmask 7168  }
  0x33   : > { %541 = vmatpush.msk.msra.mxu2 %vm287_vm0, %v826_v14  ;;  %547 = vmatpush.msk.msra.mxu3 %vm287_vm0, %v826_v14  ;;  %vm542_vm6 = vmneg %vm356_vm5  ;;  %v279_v45 = vld [vmem:[#allocation5 + $0x8] sm:$0xff]  ;;  %vm347_vm7 = vcmask 15360   ;;  %v359_v47 = vld [vmem:[#allocation7] sm:$0xff]  ;;  %vm360_vm9 = vcmask 203776   ;;  %s561_s26 = sshll.u32 %s872_s16, 4  ;;  %s222_s7 = scalar_lea.vmem [#allocation8], %s531_s24 }
  0x34   : > { %vm544_vm8 = vmneg %vm347_vm7  ;;  %s425_s4 = scalar_lea.hbm %s1017_s3, %s561_s26  ;;  %s426_s8 = sshll.u32 %s222_s7, 4  ;;  %s427_s8 = int_to_ptr.vmem [resolvable:$true] %s426_s8 }
  0x35   : > { %s428_s17 = sshll.u32 %s425_s4, 4  ;;  %s414_s16 = scalar_lea.sflag [#allocation4], %s953_s11  ;;  %s429_s17 = int_to_ptr.hbm [resolvable:$true] %s428_s17 }
  0x36   : > { %s762_s20 = sshra.s32 %s429_s17, 4  ;;  %s768_s25 = scalar_lea.hbm %s1017_s3, 32  ;;  %s763_s20 = int_to_ptr.hbm [resolvable:$true] %s762_s20 }
  0x37   : > { %s764_s21 = scalar_lea.hbm %s763_s20, 16  ;;  %p769_p11 = scmp.lt.s32.totalorder %s763_s20, %s1017_s3 }
  0x38   : > { %v229_v2 = vld.sshfl [vmem:[#allocation1] sm:$0xff pattern:$0x75316420]  ;;  %v230_v3 = vld.sshfl [vmem:[#allocation1 + $0x8] sm:$0xff pattern:$0x75316420]  ;;  %p765_p1 = scmp.ne.s32.totalorder %s763_s20, %s764_s21  ;;  %p770_p2 = scmp.lt.s32.totalorder %s768_s25, %s764_s21 }
  0x39   : > { %238 = vst [vmem:[#allocation1] ss:$2 sm:$0xff] %v226_v1  ;;  %v648_v4 = vpack.i.bf16 %v230_v3, %v229_v2 }
  0x3a   : > { %p766_p4 = pnand %p765_p1, %p920_p3  ;;  %p771_p9 = por %p770_p2, %p769_p11 }
  0x3b   : > { %649 = vrot.lane.b32.xlu1 %v648_v4, %s824_s23 }
  0x3c   : > { %p767_p8 = pneg %p766_p4 }
  0x3e   : > { %p772_p10 = pnand %p771_p9, %p767_p8 }
  0x40   : > { %v239_v5 = vld.sshfl [vmem:[#allocation1] sm:$0xff pattern:$0x75316420]  ;;  %v240_v6 = vld.sshfl [vmem:[#allocation1 + $0x8] sm:$0xff pattern:$0x75316420] }
  0x41   : > { %246 = vst [vmem:[#allocation1] ss:$2 sm:$0xff] %v225_v0  ;;  %v653_v7 = vpack.i.bf16 %v240_v6, %v239_v5 }
  0x43   : > { %654 = vrot.lane.b32.xlu1 %v653_v7, %s824_s23 }
  0x48   : > { %v247_v8 = vld.sshfl [vmem:[#allocation1] sm:$0xff pattern:$0x75316420]  ;;  %v248_v9 = vld.sshfl [vmem:[#allocation1 + $0x8] sm:$0xff pattern:$0x75316420] }
  0x49   : > { %v638_v10 = vpack.i.bf16 %v248_v9, %v247_v8  ;;  %256 = vst [vmem:[#allocation1] ss:$2 sm:$0xff] %v226_v1 }
  0x4b   : > { %639 = vrot.lane.b32.xlu0 %v638_v10, %s825_s18 }
  0x50   : > { %v257_v11 = vld.sshfl [vmem:[#allocation1] sm:$0xff pattern:$0x75316420]  ;;  %v258_v12 = vld.sshfl [vmem:[#allocation1 + $0x8] sm:$0xff pattern:$0x75316420] }
  0x51   : > { %v643_v13 = vpack.i.bf16 %v258_v12, %v257_v11 }
  0x53   : > { %644 = vrot.lane.b32.xlu0 %v643_v13, %s825_s18 }
  0xad   : > { %v650_v15 = vpop.permute.xlu1 %649 }
  0xae   : > { %v652_v16 = vunpack.i.h.bf16 %v650_v15  ;;  %v651_v17 = vunpack.i.l.bf16 %v650_v15 }
  0xb0   : > { %v236_v18 = vsel %vm235_vm1, %v651_v17, %v652_v16 }
  0xb1   : > { %v265_v23 = vrot.slane %v236_v18, 4 }
  0xb3   : > { %v274_v29 = vsel %vm273_vm3, %v225_v0, %v265_v23 }
  0xb5   : > { %v655_v20 = vpop.permute.xlu1 %654 }
  0xb6   : > { %v657_v25 = vunpack.i.h.bf16 %v655_v20  ;;  %v656_v26 = vunpack.i.l.bf16 %v655_v20 }
  0xb8   : > { %v245_v31 = vsel %vm235_vm1, %v656_v26, %v657_v25 }
  0xb9   : > { %v266_v35 = vrot.slane %v245_v31, 4 }
  0xbb   : > { %v275_v39 = vsel %vm273_vm3, %v226_v1, %v266_v35 }
  0xbd   : > { %v640_v19 = vpop.permute.xlu0 %639 }
  0xbe   : > { %v642_v21 = vunpack.i.h.bf16 %v640_v19  ;;  %v641_v22 = vunpack.i.l.bf16 %v640_v19 }
  0xc0   : > { %v254_v24 = vsel %vm253_vm2, %v641_v22, %v642_v21 }
  0xc1   : > { %v269_v27 = vrot.slane %v254_v24, 4 }
  0xc3   : > { %v276_v28 = vsel %vm273_vm3, %v254_v24, %v269_v27 }
  0xc4   : > { %305 = vmatpush.msra.mxu0 %v276_v28 }
  0xc5   : > { %v645_v32 = vpop.permute.xlu0 %644 }
  0xc6   : > { %v647_v33 = vunpack.i.h.bf16 %v645_v32  ;;  %v646_v34 = vunpack.i.l.bf16 %v645_v32  ;;  %306 = vmatpush.msra.mxu0 %v274_v29 }
  0xc7   : > { %536 = vmatmul.msk.f32.vlgmr.msra.gmra.mxu0 %vm280_vm4, %v278_v30 }
  0xc8   : > { %v263_v36 = vsel %vm253_vm2, %v646_v34, %v647_v33 }
  0xc9   : > { %v270_v37 = vrot.slane %v263_v36, 4 }
  0xcb   : > { %v277_v38 = vsel %vm273_vm3, %v263_v36, %v270_v37 }
  0xcc   : > { %328 = vmatpush.msra.mxu1 %v277_v38 }
  0xce   : > { %329 = vmatpush.msra.mxu1 %v275_v39 }
  0xcf   : > { %539 = vmatmul.msk.f32.vlgmr.msra.gmra.mxu1 %vm280_vm4, %v278_v30  ;;  %537 = vmatmul.msk.f32.gmra.mxu0 %vm280_vm4, %v279_v45 }
  0xd7   : > { %540 = vmatmul.msk.f32.gmra.mxu1 %vm280_vm4, %v279_v45 }
 0x144   : > { %v308_v40 = vpop.f32.mrf.mxu0 }
 0x145   : > { %v337_v41 = vmax.f32 %v308_v40, 0.0 }
 0x147   : > { %350 = vrot.lane.b32.xlu2 %v337_v41, %s827_s29  ;;  %377 = vmatpush.msra.mxu2 %v337_v41 }
 0x148   : > { %340 = vrot.lane.b32.xlu0 %v337_v41, %s828_s30 }
 0x14c   : > { %v331_v42 = vpop.f32.mrf.mxu1  ;;  %v311_v51 = vpop.f32.mrf.mxu0 }
 0x14d   : > { %v338_v43 = vmax.f32 %v331_v42, 0.0 }
 0x14f   : > { %344 = vrot.lane.b32.xlu1 %v338_v43, %s828_s30  ;;  %353 = vrot.lane.b32.xlu2 %v338_v43, %s827_s29 }
 0x150   : > { %397 = vmatpush.msra.mxu3 %v338_v43 }
 0x154   : > { %v334_v56 = vpop.f32.mrf.mxu1 }
 0x1a1   : > { %v351_v44 = vpop.permute.xlu2 %350 }
 0x1a2   : > { %543 = vmatpush.msk.msra.mxu2 %vm542_vm6, %v351_v44 }
 0x1a9   : > { %v354_v46 = vpop.permute.xlu2 %353 }
 0x1aa   : > { %549 = vmatpush.msk.msra.mxu3 %vm542_vm6, %v354_v46 }
 0x1ba   : > { %v341_v48 = vpop.permute.xlu0 %340 }
 0x1bb   : > { %545 = vmatpush.msk.msra.mxu2 %vm544_vm8, %v341_v48 }
 0x1bc   : > { %546 = vmatmul.msk.f32.vlgmr.msra.gmra.mxu2 %vm360_vm9, %v359_v47 }
 0x1c1   : > { %v345_v49 = vpop.permute.xlu1 %344 }
 0x1c2   : > { %551 = vmatpush.msk.msra.mxu3 %vm544_vm8, %v345_v49 }
 0x1c3   : > { %552 = vmatmul.msk.f32.vlgmr.msra.gmra.mxu3 %vm360_vm9, %v359_v47 }
 0x23f   : > { %v381_v50 = vpop.f32.mrf.mxu2 }
 0x240   : > { %v404_v52 = vmax.f32 %v381_v50, 0.0 }
 0x242   : > { %v406_v53 = vadd.f32 %v404_v52, %v311_v51 }
 0x244   : > { %v408_v54 = vmax.f32 %v406_v53, 0.0 }
 0x246   : > { %v401_v55 = vpop.f32.mrf.mxu3  ;;  %410 = vst [vmem:[%s222_s7] sm:$0xff] %v408_v54 }
 0x247   : > { %v405_v57 = vmax.f32 %v401_v55, 0.0 }
 0x249   : > { %v407_v58 = vadd.f32 %v405_v57, %v334_v56 }
 0x24b   : > { %v409_v59 = vmax.f32 %v407_v58, 0.0 }
 0x24d   : > { %553 = vst [vmem:[%s222_s7 + $0x8] sm:$0xff] %v409_v59 }
 0x24e   : > { %775 = shalt.err (!%p772_p10)
}
 0x24f   : > { %s829_s11 = smov 128   ;;  %s830_s18 = smov 8  }
 0x250   : > { %572 = dma.vmem_to_hbm [thread:$0]  (%p920_p3), %s427_s8, 256, %s429_s17, %s414_s16, %s829_s11, %s829_s11, %s830_s18  }
 0x251 PF: > { %s443_s29 = sand.u32 1, %s806_s12   ;;  %p1023_p12 = scmp.ge.s32.totalorder %s818_s15, 2 }
 0x252   : > { %s444_s30 = scalar_lea.sflag [#allocation4], %s443_s29 }
 0x253   : > { %p586_p13 = pnand %p1023_p12, %p886_p6 }
 0x255   : > { %p587_p0 = pneg %p586_p13 }
 0x257   : > { %801 = dma.done.wait (%p587_p0), %s444_s30, 256  }
 0x258   : > { %803 = vsyncadd (%p587_p0), %s444_s30, 4294967040  ;;  %p17_p5 = scmp.ge.s32.totalorder %s910_s6, 4   ;;  %s1024_s12 = smov %s810_s13 }
 0x259   : > { %s1025_s13 = smov %s814_s14  ;;  %s1026_s14 = smov %s926_s10 }
 0x25a   : > { %s1027_s15 = smov %s910_s6  ;;  %19 = sbr.rel (!%p17_p5) target bundleno = 6 (0x6), region = 86 }
 0x25f   :  { %450 = vsyncpa [#allocation3], 1 }
 0x260   :  { %452 = vsyncpa [#allocation3 + $0x1], 1 }
 0x261   :  { %453 = vsyncpa [#allocation6], 1 }
 0x262   :  { %454 = vsyncpa [#allocation4], 1 }
 0x263   :  { %456 = vsyncpa [#allocation4 + $0x1], 1 }

</bundles_post_ra>
